<compile_context>
chip_gen: v7x
topology: tpu7x:2x2x1
jax: 0.10.0
libtpu: 0.0.40
codegen_flags: <defaults>
</compile_context>

<pallas_src>
import functools
import math

import jax
import jax.numpy as jnp
from jax import lax
from jax.experimental import pallas as pl
from jax.experimental.pallas import tpu as pltpu

_INV_TWO_PI = 1.0 / (2.0 * math.pi)


def _prediction_loss_kernel(x_ref, t_ref, o_ref, acc_ref, *,
                            sub_tile, n_valid, has_pad, bg_rate):
    # Grid: (num_splits [parallel], steps [arbitrary / reduction]).
    p = pl.program_id(0)
    i = pl.program_id(1)
    n_steps = pl.num_programs(1)

    @pl.when(i == 0)
    def _():
        acc_ref[...] = jnp.zeros_like(acc_ref)

    # Dense (sub_tile, 128) tiles per gaussian parameter / coordinate.
    mu1 = x_ref[0]
    mu2 = x_ref[1]
    s1 = x_ref[2]
    s2 = x_ref[3]
    rho = x_ref[4]
    x1 = t_ref[0]
    x2 = t_ref[1]

    norm1 = x1 - mu1
    norm2 = x2 - mu2

    # Foreground gaussian N(x | mu, sigma, rho) with reciprocal algebra:
    #   z = (n1/s1)^2 + (n2/s2)^2 - 2 rho n1 n2 / (s1 s2)
    #   g = exp(-z / (2 (1-rho^2))) / (2 pi s1 s2 sqrt(1-rho^2))
    inv_s1 = 1.0 / s1
    inv_s2 = 1.0 / s2
    n1s = norm1 * inv_s1
    n2s = norm2 * inv_s2
    one_m_rho2 = 1.0 - rho * rho
    inv_omr2 = 1.0 / one_m_rho2
    z = n1s * n1s + n2s * n2s - 2.0 * rho * (n1s * n2s)
    # 1/sqrt(a) == sqrt(a) * (1/a): reuses inv_omr2, stays exact.
    g_fg = (jnp.exp(-0.5 * z * inv_omr2)
            * _INV_TWO_PI * inv_s1 * inv_s2
            * (jnp.sqrt(one_m_rho2) * inv_omr2))

    # Background gaussian: s1 = s2 = 3.0, rho = 0 (all constant-folded).
    g_bg = (jnp.exp((norm1 * norm1 + norm2 * norm2) * (-1.0 / 18.0))
            * (_INV_TWO_PI / 9.0))

    values = -jnp.log(0.01 + bg_rate * g_bg + (0.99 - bg_rate) * g_fg)

    def accumulate(vals):
        # Fold (sub_tile, 128) -> (8, 128) with plain vector adds; the single
        # cross-lane reduce happens once in the epilogue.
        folded = acc_ref[...]
        for r in range(0, sub_tile, 8):
            folded = folded + vals[r:r + 8]
        acc_ref[...] = folded

    if has_pad:
        blk = p * n_steps + i
        block_elems = sub_tile * 128
        fully_valid = (blk + 1) * block_elems <= n_valid

        @pl.when(fully_valid)
        def _():
            accumulate(values)

        @pl.when(jnp.logical_not(fully_valid))
        def _():
            # Only the block(s) that contain padded columns pay for the mask.
            row = lax.broadcasted_iota(jnp.int32, (sub_tile, 128), 0)
            lane = lax.broadcasted_iota(jnp.int32, (sub_tile, 128), 1)
            idx = blk * block_elems + row * 128 + lane
            accumulate(jnp.where(idx < n_valid, values, 0.0))
    else:
        accumulate(values)

    @pl.when(i == n_steps - 1)
    def _():
        o_ref[...] = jnp.sum(acc_ref[...]).reshape(1, 1, 1)


def _cdiv(a, b):
    return -(-a // b)


def _round_up(x, m):
    return ((x + m - 1) // m) * m


def _default_num_splits():
    """2-way parallel grid only on dual-TensorCore chips (v7x)."""
    try:
        kind = jax.devices()[0].device_kind.lower()
    except Exception:
        return 1
    if "v7" in kind or "tpu7" in kind or "7x" in kind:
        return 2
    return 1


def prediction_loss(inputs, targets, *, background_rate=0.2,
                    sub_tile=256, num_splits=None):
    """Pallas equivalent of PredictionLoss().forward(inputs, targets).

    inputs:  (N, 5) gaussian params (mu_x, mu_y, s_x, s_y, rho)
    targets: (N, 2) observed (x, y)
    returns: scalar float32 (mean negative log-likelihood)
    """
    n, d = inputs.shape
    assert d == 5, "inputs must be (N, 5)"
    assert targets.shape == (n, 2), "targets must be (N, 2)"

    inputs = inputs.astype(jnp.float32)
    targets = targets.astype(jnp.float32)

    if num_splits is None:
        num_splits = _default_num_splits()
    num_splits = max(1, int(num_splits))

    # Rows of 128 lane-dense elements.
    n_rows = _cdiv(n, 128)
    if n_rows <= sub_tile:
        num_splits = 1  # not enough work to be worth a parallel split

    rows_per_split = _cdiv(n_rows, num_splits)
    sub = max(8, min(int(sub_tile), _round_up(rows_per_split, 8)))
    sub = _round_up(sub, 8)
    steps = _cdiv(rows_per_split, sub)
    total_rows = num_splits * steps * sub
    n_pad = total_rows * 128
    pad = n_pad - n

    if pad:
        # Safe padding values (s=1, rho=0) -> finite; masked in-kernel so the
        # mean denominator stays N.
        pad_in = jnp.tile(
            jnp.array([[0.0, 0.0, 1.0, 1.0, 0.0]], jnp.float32), (pad, 1))
        inputs = jnp.concatenate([inputs, pad_in], axis=0)
        targets = jnp.concatenate(
            [targets, jnp.zeros((pad, 2), jnp.float32)], axis=0)

    # Lane/sublane-dense repack: examples on (rows, 128), params on leading dim.
    # TODO(synk): if this runs every step, have the producer emit this
    # (5, rows, 128) layout directly to avoid the pad+transpose HBM round trip.
    x3 = inputs.T.reshape(5, total_rows, 128)
    t3 = targets.T.reshape(2, total_rows, 128)

    kernel = functools.partial(
        _prediction_loss_kernel, sub_tile=sub, n_valid=n,
        has_pad=(pad > 0), bg_rate=float(background_rate))

    partials = pl.pallas_call(
        kernel,
        out_shape=jax.ShapeDtypeStruct((num_splits, 1, 1), jnp.float32),
        grid_spec=pltpu.PrefetchScalarGridSpec(
            num_scalar_prefetch=0,
            grid=(num_splits, steps),
            in_specs=[
                pl.BlockSpec((5, sub, 128), lambda p, i: (0, p * steps + i, 0)),
                pl.BlockSpec((2, sub, 128), lambda p, i: (0, p * steps + i, 0)),
            ],
            out_specs=pl.BlockSpec((1, 1, 1), lambda p, i: (p, 0, 0)),
            scratch_shapes=[pltpu.VMEM((8, 128), jnp.float32)],
        ),
        compiler_params=pltpu.CompilerParams(
            dimension_semantics=("parallel", "arbitrary"),
        ),
    )(x3, t3)

    # Combine per-split partial sums; 'mean' reduction (size_average=True).
    # TODO(synk): reduce=False / size_average=False paths of the PyTorch module
    # are not implemented; only the default mean reduction is provided.
    return jnp.sum(partials) / jnp.float32(n)


def _prediction_loss_ref(inputs, targets, background_rate=0.2):
    """Pure-JAX reference mirroring the PyTorch module."""
    x1, x2 = targets[:, 0], targets[:, 1]
    mu1, mu2, s1, s2, rho = (inputs[:, 0], inputs[:, 1], inputs[:, 2],
                             inputs[:, 3], inputs[:, 4])

    def gaussian_2d(mu1, mu2, s1, s2, rho):
        norm1 = x1 - mu1
        norm2 = x2 - mu2
        s1s2 = s1 * s2
        z = (norm1 / s1) ** 2 + (norm2 / s2) ** 2 \
            - 2 * rho * norm1 * norm2 / s1s2
        num = jnp.exp(-z / (2 * (1 - rho ** 2)))
        den = 2.0 * math.pi * s1s2 * jnp.sqrt(1 - rho ** 2)
        return num / den

    g_fg = gaussian_2d(mu1, mu2, s1, s2, rho)
    g_bg = gaussian_2d(mu1, mu2, 3.0, 3.0, 0.0)
    values = -jnp.log(0.01 + background_rate * g_bg
                      + (0.99 - background_rate) * g_fg)
    return jnp.mean(values)


if __name__ == "__main__":
    key = jax.random.PRNGKey(0)

    def make_case(k, n):
        k1, k2, k3, k4 = jax.random.split(k, 4)
        mu = jax.random.normal(k1, (n, 2), dtype=jnp.float32)
        sig = jnp.exp(0.2 * jax.random.normal(k2, (n, 2), dtype=jnp.float32))
        rho = 0.8 * jnp.tanh(jax.random.normal(k3, (n, 1), dtype=jnp.float32))
        inputs = jnp.concatenate([mu, sig, rho], axis=1)            # (N, 5)
        targets = mu + 0.5 * jax.random.normal(k4, (n, 2), dtype=jnp.float32)
        return inputs, targets

    ks = jax.random.split(key, 2)
    case_small = make_case(ks[0], 64)      # single, partially padded block
    case_multi = make_case(ks[1], 2000)    # exercises multi-step / multi-split

    checks = [
        (case_small, {}),                                   # default config
        (case_multi, dict(sub_tile=8, num_splits=1)),       # multi-step reduction
        (case_multi, dict(sub_tile=8, num_splits=2)),       # parallel split axis
    ]

    for (inp, tgt), kw in checks:
        loss = jax.block_until_ready(prediction_loss(inp, tgt, **kw))
        ref = jax.block_until_ready(_prediction_loss_ref(inp, tgt))
        assert jnp.isfinite(loss), (loss, kw)
        assert jnp.allclose(loss, ref, rtol=1e-5, atol=1e-5), (loss, ref, kw)

    print("KERNEL_OK")
</pallas_src>

<mosaic_0001>
module attributes {stable_mosaic.version = 11 : i64} {
  func.func @_prediction_loss_kernel(%arg0: i32, %arg1: i32, %arg2: memref<5x8x128xf32, #tpu.memory_space<vmem>>, %arg3: memref<2x8x128xf32, #tpu.memory_space<vmem>>, %arg4: memref<1x1x1xf32, #tpu.memory_space<vmem>>, %arg5: memref<8x128xf32, #tpu.memory_space<vmem>>) attributes {dimension_semantics = [#tpu.dimension_semantics<parallel>, #tpu.dimension_semantics<arbitrary>], iteration_bounds = array<i64: 1, 1>, scalar_prefetch = 0 : i64, scratch_operands = 1 : i64, tpu.core_type = #tpu.core_type<tc>, window_params = [{transform_indices = @transform_0, window_bounds = array<i64: 5, 8, 128>}, {transform_indices = @transform_1, window_bounds = array<i64: 2, 8, 128>}, {transform_indices = @transform_2, window_bounds = array<i64: 1, 1, 1>}]} {
    %c0_i32 = arith.constant 0 : i32
    %0 = arith.cmpi eq, %arg1, %c0_i32 : i32
    %1 = arith.extui %0 : i1 to i32
    %c0_i32_0 = arith.constant 0 : i32
    %2 = arith.cmpi ne, %1, %c0_i32_0 : i32
    scf.if %2 {
      %cst_34 = arith.constant 0.000000e+00 : f32
      %80 = vector.broadcast %cst_34 : f32 to vector<8x128xf32>
      %c0_35 = arith.constant 0 : index
      %c0_36 = arith.constant 0 : index
      %81 = vector.load %arg5[%c0_35, %c0_36] : memref<8x128xf32, #tpu.memory_space<vmem>>, vector<8x128xf32>
      tpu.vector_store %arg5[%c0_35, %c0_36], %80 {strides = array<i32>} : memref<8x128xf32, #tpu.memory_space<vmem>>, vector<8x128xf32>,
    } else {
    }
    %c0 = arith.constant 0 : index
    %c0_1 = arith.constant 0 : index
    %c0_2 = arith.constant 0 : index
    %3 = vector.load %arg2[%c0, %c0_1, %c0_2] : memref<5x8x128xf32, #tpu.memory_space<vmem>>, vector<1x8x128xf32>
    %4 = vector.shape_cast %3 : vector<1x8x128xf32> to vector<8x128xf32>
    %c1 = arith.constant 1 : index
    %c0_3 = arith.constant 0 : index
    %c0_4 = arith.constant 0 : index
    %5 = vector.load %arg2[%c1, %c0_3, %c0_4] : memref<5x8x128xf32, #tpu.memory_space<vmem>>, vector<1x8x128xf32>
    %6 = vector.shape_cast %5 : vector<1x8x128xf32> to vector<8x128xf32>
    %c2 = arith.constant 2 : index
    %c0_5 = arith.constant 0 : index
    %c0_6 = arith.constant 0 : index
    %7 = vector.load %arg2[%c2, %c0_5, %c0_6] : memref<5x8x128xf32, #tpu.memory_space<vmem>>, vector<1x8x128xf32>
    %8 = vector.shape_cast %7 : vector<1x8x128xf32> to vector<8x128xf32>
    %c3 = arith.constant 3 : index
    %c0_7 = arith.constant 0 : index
    %c0_8 = arith.constant 0 : index
    %9 = vector.load %arg2[%c3, %c0_7, %c0_8] : memref<5x8x128xf32, #tpu.memory_space<vmem>>, vector<1x8x128xf32>
    %10 = vector.shape_cast %9 : vector<1x8x128xf32> to vector<8x128xf32>
    %c4 = arith.constant 4 : index
    %c0_9 = arith.constant 0 : index
    %c0_10 = arith.constant 0 : index
    %11 = vector.load %arg2[%c4, %c0_9, %c0_10] : memref<5x8x128xf32, #tpu.memory_space<vmem>>, vector<1x8x128xf32>
    %12 = vector.shape_cast %11 : vector<1x8x128xf32> to vector<8x128xf32>
    %c0_11 = arith.constant 0 : index
    %c0_12 = arith.constant 0 : index
    %c0_13 = arith.constant 0 : index
    %13 = vector.load %arg3[%c0_11, %c0_12, %c0_13] : memref<2x8x128xf32, #tpu.memory_space<vmem>>, vector<1x8x128xf32>
    %14 = vector.shape_cast %13 : vector<1x8x128xf32> to vector<8x128xf32>
    %c1_14 = arith.constant 1 : index
    %c0_15 = arith.constant 0 : index
    %c0_16 = arith.constant 0 : index
    %15 = vector.load %arg3[%c1_14, %c0_15, %c0_16] : memref<2x8x128xf32, #tpu.memory_space<vmem>>, vector<1x8x128xf32>
    %16 = vector.shape_cast %15 : vector<1x8x128xf32> to vector<8x128xf32>
    %17 = arith.subf %14, %4 : vector<8x128xf32>
    %18 = arith.subf %16, %6 : vector<8x128xf32>
    %cst = arith.constant 1.000000e+00 : f32
    %19 = vector.broadcast %cst : f32 to vector<8x128xf32>
    %20 = arith.divf %19, %8 : vector<8x128xf32>
    %cst_17 = arith.constant 1.000000e+00 : f32
    %21 = vector.broadcast %cst_17 : f32 to vector<8x128xf32>
    %22 = arith.divf %21, %10 : vector<8x128xf32>
    %23 = arith.mulf %17, %20 : vector<8x128xf32>
    %24 = arith.mulf %18, %22 : vector<8x128xf32>
    %25 = arith.mulf %12, %12 : vector<8x128xf32>
    %cst_18 = arith.constant 1.000000e+00 : f32
    %26 = vector.broadcast %cst_18 : f32 to vector<8x128xf32>
    %27 = arith.subf %26, %25 : vector<8x128xf32>
    %cst_19 = arith.constant 1.000000e+00 : f32
    %28 = vector.broadcast %cst_19 : f32 to vector<8x128xf32>
    %29 = arith.divf %28, %27 : vector<8x128xf32>
    %30 = arith.mulf %23, %23 : vector<8x128xf32>
    %31 = arith.mulf %24, %24 : vector<8x128xf32>
    %32 = arith.addf %30, %31 : vector<8x128xf32>
    %cst_20 = arith.constant 2.000000e+00 : f32
    %33 = vector.broadcast %cst_20 : f32 to vector<8x128xf32>
    %34 = arith.mulf %33, %12 : vector<8x128xf32>
    %35 = arith.mulf %23, %24 : vector<8x128xf32>
    %36 = arith.mulf %34, %35 : vector<8x128xf32>
    %37 = arith.subf %32, %36 : vector<8x128xf32>
    %cst_21 = arith.constant -5.000000e-01 : f32
    %38 = vector.broadcast %cst_21 : f32 to vector<8x128xf32>
    %39 = arith.mulf %38, %37 : vector<8x128xf32>
    %40 = arith.mulf %39, %29 : vector<8x128xf32>
    %41 = math.exp %40 : vector<8x128xf32>
    %cst_22 = arith.constant 0.159154937 : f32
    %42 = vector.broadcast %cst_22 : f32 to vector<8x128xf32>
    %43 = arith.mulf %41, %42 : vector<8x128xf32>
    %44 = arith.mulf %43, %20 : vector<8x128xf32>
    %45 = arith.mulf %44, %22 : vector<8x128xf32>
    %46 = math.sqrt %27 : vector<8x128xf32>
    %47 = arith.mulf %46, %29 : vector<8x128xf32>
    %48 = arith.mulf %45, %47 : vector<8x128xf32>
    %49 = arith.mulf %17, %17 : vector<8x128xf32>
    %50 = arith.mulf %18, %18 : vector<8x128xf32>
    %51 = arith.addf %49, %50 : vector<8x128xf32>
    %cst_23 = arith.constant -0.055555556 : f32
    %52 = vector.broadcast %cst_23 : f32 to vector<8x128xf32>
    %53 = arith.mulf %51, %52 : vector<8x128xf32>
    %54 = math.exp %53 : vector<8x128xf32>
    %cst_24 = arith.constant 0.0176838823 : f32
    %55 = vector.broadcast %cst_24 : f32 to vector<8x128xf32>
    %56 = arith.mulf %54, %55 : vector<8x128xf32>
    %cst_25 = arith.constant 2.000000e-01 : f32
    %57 = vector.broadcast %cst_25 : f32 to vector<8x128xf32>
    %58 = arith.mulf %57, %56 : vector<8x128xf32>
    %cst_26 = arith.constant 0.00999999977 : f32
    %59 = vector.broadcast %cst_26 : f32 to vector<8x128xf32>
    %60 = arith.addf %59, %58 : vector<8x128xf32>
    %cst_27 = arith.constant 7.900000e-01 : f32
    %61 = vector.broadcast %cst_27 : f32 to vector<8x128xf32>
    %62 = arith.mulf %61, %48 : vector<8x128xf32>
    %63 = arith.addf %60, %62 : vector<8x128xf32>
    %64 = math.log %63 : vector<8x128xf32>
    %cst_28 = arith.constant 0.000000e+00 : f32
    %65 = vector.broadcast %cst_28 : f32 to vector<8x128xf32>
    %66 = arith.subf %65, %64 : vector<8x128xf32>
    %c1_i32 = arith.constant 1 : i32
    %67 = arith.muli %arg0, %c1_i32 : i32
    %68 = arith.addi %67, %arg1 : i32
    %c1_i32_29 = arith.constant 1 : i32
    %69 = arith.addi %68, %c1_i32_29 : i32
    %c1024_i32 = arith.constant 1024 : i32
    %70 = arith.muli %69, %c1024_i32 : i32
    %c64_i32 = arith.constant 64 : i32
    %71 = arith.cmpi sle, %70, %c64_i32 : i32
    %72 = arith.extui %71 : i1 to i32
    %c0_i32_30 = arith.constant 0 : i32
    %73 = arith.cmpi ne, %72, %c0_i32_30 : i32
    scf.if %73 {
      %c0_34 = arith.constant 0 : index
      %c0_35 = arith.constant 0 : index
      %80 = vector.load %arg5[%c0_34, %c0_35] : memref<8x128xf32, #tpu.memory_space<vmem>>, vector<8x128xf32>
      %81 = arith.addf %80, %66 : vector<8x128xf32>
      %c0_36 = arith.constant 0 : index
      %c0_37 = arith.constant 0 : index
      %82 = vector.load %arg5[%c0_36, %c0_37] : memref<8x128xf32, #tpu.memory_space<vmem>>, vector<8x128xf32>
      tpu.vector_store %arg5[%c0_36, %c0_37], %81 {strides = array<i32>} : memref<8x128xf32, #tpu.memory_space<vmem>>, vector<8x128xf32>,
    } else {
    }
    %true = arith.constant true
    %74 = arith.xori %71, %true : i1
    %75 = arith.extui %74 : i1 to i32
    %c0_i32_31 = arith.constant 0 : i32
    %76 = arith.cmpi ne, %75, %c0_i32_31 : i32
    scf.if %76 {
      %80 = tpu.iota {dimensions = array<i32: 0>} : vector<8x128xi32>
      %81 = tpu.iota {dimensions = array<i32: 1>} : vector<8x128xi32>
      %c1024_i32_34 = arith.constant 1024 : i32
      %82 = arith.muli %68, %c1024_i32_34 : i32
      %c128_i32 = arith.constant 128 : i32
      %83 = vector.broadcast %c128_i32 : i32 to vector<8x128xi32>
      %84 = arith.muli %80, %83 : vector<8x128xi32>
      %85 = vector.broadcast %82 : i32 to vector<8x128xi32>
      %86 = arith.addi %85, %84 : vector<8x128xi32>
      %87 = arith.addi %86, %81 : vector<8x128xi32>
      %c64_i32_35 = arith.constant 64 : i32
      %88 = vector.broadcast %c64_i32_35 : i32 to vector<8x128xi32>
      %89 = arith.cmpi slt, %87, %88 : vector<8x128xi32>
      %cst_36 = arith.constant 0.000000e+00 : f32
      %90 = vector.broadcast %cst_36 : f32 to vector<8x128xf32>
      %91 = arith.select %89, %66, %90 : vector<8x128xi1>, vector<8x128xf32>
      %c0_37 = arith.constant 0 : index
      %c0_38 = arith.constant 0 : index
      %92 = vector.load %arg5[%c0_37, %c0_38] : memref<8x128xf32, #tpu.memory_space<vmem>>, vector<8x128xf32>
      %93 = arith.addf %92, %91 : vector<8x128xf32>
      %c0_39 = arith.constant 0 : index
      %c0_40 = arith.constant 0 : index
      %94 = vector.load %arg5[%c0_39, %c0_40] : memref<8x128xf32, #tpu.memory_space<vmem>>, vector<8x128xf32>
      tpu.vector_store %arg5[%c0_39, %c0_40], %93 {strides = array<i32>} : memref<8x128xf32, #tpu.memory_space<vmem>>, vector<8x128xf32>,
    } else {
    }
    %c0_i32_32 = arith.constant 0 : i32
    %77 = arith.cmpi eq, %arg1, %c0_i32_32 : i32
    %78 = arith.extui %77 : i1 to i32
    %c0_i32_33 = arith.constant 0 : i32
    %79 = arith.cmpi ne, %78, %c0_i32_33 : i32
    scf.if %79 {
      %c0_34 = arith.constant 0 : index
      %c0_35 = arith.constant 0 : index
      %80 = vector.load %arg5[%c0_34, %c0_35] : memref<8x128xf32, #tpu.memory_space<vmem>>, vector<8x128xf32>
      %81 = vector.shape_cast %80 : vector<8x128xf32> to vector<1x8x128xf32>
      %cst_36 = arith.constant dense<0.000000e+00> : vector<1xf32>
      %82 = vector.multi_reduction <add>, %81, %cst_36 [1, 2] : vector<1x8x128xf32> to vector<1xf32>
      %83 = vector.shape_cast %82 : vector<1xf32> to vector<1x1x1xf32>
      %84 = vector.extract %83[0, 0, 0] : f32 from vector<1x1x1xf32>
      %85 = vector.broadcast %84 : f32 to vector<1x1x1xf32>
      %c0_37 = arith.constant 0 : index
      %c0_38 = arith.constant 0 : index
      %c0_39 = arith.constant 0 : index
      %86 = vector.load %arg4[%c0_37, %c0_38, %c0_39] : memref<1x1x1xf32, #tpu.memory_space<vmem>>, vector<1x1x1xf32>
      tpu.vector_store %arg4[%c0_37, %c0_38, %c0_39], %85 {strides = array<i32>} : memref<1x1x1xf32, #tpu.memory_space<vmem>>, vector<1x1x1xf32>,
    } else {
    }
    return
  }
  func.func @transform_0(%arg0: i32, %arg1: i32) -> (i32, i32, i32) {
    %c1_i32 = arith.constant 1 : i32
    %0 = arith.muli %arg0, %c1_i32 : i32
    %1 = arith.addi %0, %arg1 : i32
    %c0_i32 = arith.constant 0 : i32
    %c0_i32_0 = arith.constant 0 : i32
    %c0_i32_1 = arith.constant 0 : i32
    return %c0_i32, %1, %c0_i32_0 : i32, i32, i32
  }
  func.func @transform_1(%arg0: i32, %arg1: i32) -> (i32, i32, i32) {
    %c1_i32 = arith.constant 1 : i32
    %0 = arith.muli %arg0, %c1_i32 : i32
    %1 = arith.addi %0, %arg1 : i32
    %c0_i32 = arith.constant 0 : i32
    %c0_i32_0 = arith.constant 0 : i32
    %c0_i32_1 = arith.constant 0 : i32
    return %c0_i32, %1, %c0_i32_0 : i32, i32, i32
  }
  func.func @transform_2(%arg0: i32, %arg1: i32) -> (i32, i32, i32) {
    %c0_i32 = arith.constant 0 : i32
    %c0_i32_0 = arith.constant 0 : i32
    %c0_i32_1 = arith.constant 0 : i32
    return %arg0, %c0_i32, %c0_i32_0 : i32, i32, i32
  }
}

</mosaic_0001>

<bundles_post_ra>
// kernel: tpu_custom_call.1
= control target key start
LH: loop header
LB: loop body
LE: loop exit
PB: predicated region body
PF: predicated region fallthrough
CT: control target
= control target key end

     0   :  { %7 = vsyncpa [#allocation4], 0  ;;  %s323_s0 = inlined_call_operand.hbm [shape: f32[5,8,128], index: 0, kind: input, shape index: {}]   ;;  %s324_s1 = inlined_call_operand.hbm [shape: f32[2,8,128], index: 1, kind: input, shape index: {}]   ;;  %s325_s2 = inlined_call_operand.hbm [shape: f32[1,1,1], index: 2, kind: output, shape index: {}]  }
   0x1   :  { %8 = vsyncpa [#allocation7], 0 }
   0x2   :  { %9 = vsyncpa [#allocation5], 0  ;;  %s267_s9 = smov [#allocation3]   ;;  %s195_s13 = scalar_lea.hbm %s323_s0, 640 }
   0x3   :  { %s18_s10 = sshll.u32 %s267_s9, 4  ;;  %p196_p0 = scmp.ne.s32.totalorder %s323_s0, %s195_s13  ;;  %s19_s10 = int_to_ptr.vmem [resolvable:$true] %s18_s10 }
   0x4   :  { %p199_p1 = scmp.lt.u32.totalorder %s195_s13, %s323_s0 }
   0x6   :  { %p201_p2 = pnand %p199_p1, %p196_p0 }
   0x8   :  { %204 = shalt.err (!%p201_p2)
}
   0x9   :  { %s205_s18 = scalar_lea.vmem %s19_s10, 640  ;;  %p210_p4 = scmp.lt.s32.totalorder %s19_s10, %s19_s10 }
   0xa   :  { %p206_p3 = scmp.ne.s32.totalorder %s19_s10, %s205_s18  ;;  %p211_p5 = scmp.lt.s32.totalorder %s205_s18, %s205_s18 }
   0xc   :  { %p212_p6 = por %p211_p5, %p210_p4 }
   0xe   :  { %p213_p7 = pnand %p212_p6, %p206_p3 }
  0x10   :  { %216 = shalt.err (!%p213_p7)
}
  0x11   :  { %s268_s19 = smov 128   ;;  %s269_s20 = smov 8  }
  0x12   :  { %24 = dma.hbm_to_vmem [thread:$0]  %s323_s0, 640, %s19_s10, [#allocation4], %s268_s19, %s268_s19, %s269_s20  }
  0x13   :  { %s270_s23 = smov [#allocation6]   ;;  %s217_s27 = scalar_lea.hbm %s324_s1, 256 }
  0x14   :  { %s33_s24 = sshll.u32 %s270_s23, 4  ;;  %p218_p8 = scmp.ne.s32.totalorder %s324_s1, %s217_s27  ;;  %s34_s24 = int_to_ptr.vmem [resolvable:$true] %s33_s24 }
  0x15   :  { %p221_p9 = scmp.lt.u32.totalorder %s217_s27, %s324_s1 }
  0x17   :  { %p223_p10 = pnand %p221_p9, %p218_p8 }
  0x19   :  { %226 = shalt.err (!%p223_p10)
}
  0x1a   :  { %s227_s4 = scalar_lea.vmem %s34_s24, 256  ;;  %p232_p12 = scmp.lt.s32.totalorder %s34_s24, %s34_s24 }
  0x1b   :  { %p228_p11 = scmp.ne.s32.totalorder %s34_s24, %s227_s4  ;;  %p233_p13 = scmp.lt.s32.totalorder %s227_s4, %s227_s4 }
  0x1d   :  { %p234_p0 = por %p233_p13, %p232_p12 }
  0x1f   :  { %p235_p1 = pnand %p234_p0, %p228_p11 }
  0x21   :  { %238 = shalt.err (!%p235_p1)
}
  0x22   :  { %39 = dma.hbm_to_vmem [thread:$0]  %s324_s1, 256, %s34_s24, [#allocation7], %s268_s19, %s268_s19, %s269_s20  }
  0x23   :  { %261 = dma.done.wait [#allocation4], 640  }
  0x24   :  { %262 = vsyncadd [#allocation4], 4294966656 }
  0x25   :  { %263 = dma.done.wait [#allocation7], 256  }
  0x26   :  { %264 = vsyncadd [#allocation7], 4294967040  ;;  %v57_v0 = vld [vmem:[#allocation3 + $0x10] sm:$0xff]  ;;  %v53_v1 = vld [vmem:[#allocation3] sm:$0xff]  ;;  %v128_v47 = vlaneseq  ;;  %s271_s1 = smov [#allocation8]   ;;  %vm156_vm3 = vcmask 0  }
  0x27   :  { %v59_v2 = vld [vmem:[#allocation3 + $0x18] sm:$0xff]  ;;  %v61_v3 = vld [vmem:[#allocation3 + $0x20] sm:$0xff]  ;;  %181 = vrcp.f32 %v57_v0  ;;  %v55_v4 = vld [vmem:[#allocation3 + $0x8] sm:$0xff]  ;;  %s164_s6 = sshll.u32 %s271_s1, 4  ;;  %s165_s6 = int_to_ptr.vmem [resolvable:$true] %s164_s6 }
  0x28   :  { %v62_v5 = vld [vmem:[#allocation6] sm:$0xff]  ;;  %v64_v6 = vld [vmem:[#allocation6 + $0x8] sm:$0xff]  ;;  %183 = vrcp.f32 %v59_v2  ;;  %v73_v7 = vmul.f32 %v61_v3, %v61_v3  ;;  %v80_v18 = vmul.f32 2.0, %v61_v3  ;;  %v129_v49 = vshrl.u32 %v128_v47, 7  ;;  %s239_s8 = scalar_lea.vmem %s165_s6, 16  ;;  %s243_s9 = scalar_lea.vmem %s165_s6, 32 }
  0x29   :  { %v65_v8 = vsub.f32 %v62_v5, %v53_v1  ;;  %v66_v9 = vsub.f32 %v64_v6, %v55_v4  ;;  %v131_v50 = vand.u32 127, %v128_v47  ;;  %p240_p2 = scmp.ne.s32.totalorder %s165_s6, %s239_s8  ;;  %p244_p3 = scmp.lt.s32.totalorder %s165_s6, %s165_s6 }
  0x2a   :  { %v74_v10 = vsub.f32 1.0, %v73_v7  ;;  %v133_v51 = vmul.u32 128, %v129_v49  ;;  %p245_p4 = scmp.lt.s32.totalorder %s243_s9, %s239_s8 }
  0x2b   :  { %v100_v11 = vmul.f32 %v65_v8, %v65_v8  ;;  %v101_v12 = vmul.f32 %v66_v9, %v66_v9 }
  0x2c   :  { %185 = vrcp.f32 %v74_v10  ;;  %vm93_vm0 = vcmp.eq.f32.partialorder %v74_v10, inf  ;;  %v96_v34 = vand.u32 2147483648, %v74_v10  ;;  %vm95_vm1 = vcmp.eq.f32.partialorder %v74_v10, 0.0  ;;  %p246_p5 = por %p245_p4, %p244_p3 }
  0x2d   :  { %v102_v14 = vadd.f32 %v101_v12, %v100_v11  ;;  %187 = vrsqrt.f32 %v74_v10  ;;  %v136_v52 = vadd.s32 %v133_v51, %v131_v50 }
  0x2e   :  { %p247_p6 = pnand %p246_p5, %p240_p2 }
  0x2f   :  { %v103_v22 = vmul.f32 -0.055555556, %v102_v14  ;;  %vm137_vm2 = vcmp.lt.s32.totalorder %v136_v52, 64 }
  0x31   :  { %v182_v13 = vpop.eup %181  ;;  %v104_v26 = vmul.f32 1.442695, %v103_v22 }
  0x32   :  { %v184_v15 = vpop.eup %183  ;;  %v71_v16 = vmul.f32 %v182_v13, %v65_v8 }
  0x33   :  { %v72_v17 = vmul.f32 %v184_v15, %v66_v9  ;;  %189 = vpow2.f32 %v104_v26 }
  0x34   :  { %v77_v19 = vmul.f32 %v71_v16, %v71_v16 }
  0x35   :  { %v78_v20 = vmul.f32 %v72_v17, %v72_v17  ;;  %v81_v21 = vmul.f32 %v72_v17, %v71_v16 }
  0x36   :  { %v186_v27 = vpop.eup %185 }
  0x37   :  { %v79_v23 = vadd.f32 %v78_v20, %v77_v19  ;;  %v82_v24 = vmul.f32 %v81_v21, %v80_v18  ;;  %v188_v31 = vpop.eup %187 }
  0x38   :  { %v92_v32 = vmul.f32 %v188_v31, %v74_v10 }
  0x39   :  { %v83_v25 = vsub.f32 %v79_v23, %v82_v24 }
  0x3a   :  { %v94_v35 = vsel %vm93_vm0, %v74_v10, %v92_v32 }
  0x3b   :  { %v84_v28 = vmul.f32 -0.5, %v83_v25  ;;  %v97_v38 = vsel %vm95_vm1, %v96_v34, %v94_v35 }
  0x3c   :  { %v98_v41 = vmul.f32 %v186_v27, %v97_v38 }
  0x3d   :  { %v85_v29 = vmul.f32 %v186_v27, %v84_v28  ;;  %v190_v33 = vpop.eup %189 }
  0x3e   :  { %v106_v36 = vmul.f32 0.017683882, %v190_v33 }
  0x3f   :  { %v86_v30 = vmul.f32 1.442695, %v85_v29 }
  0x40   :  { %v107_v42 = vmul.f32 0.2, %v106_v36 }
  0x41   :  { %191 = vpow2.f32 %v86_v30 }
  0x42   :  { %v108_v45 = vadd.f32 0.01, %v107_v42 }
  0x4b   :  { %v192_v37 = vpop.eup %191 }
  0x4c   :  { %v88_v39 = vmul.f32 0.15915494, %v192_v37 }
  0x4e   :  { %v89_v40 = vmul.f32 %v182_v13, %v88_v39 }
  0x50   :  { %v90_v43 = vmul.f32 %v184_v15, %v89_v40 }
  0x52   :  { %v99_v44 = vmul.f32 %v98_v41, %v90_v43 }
  0x54   :  { %v109_v46 = vmul.f32 0.79, %v99_v44 }
  0x56   :  { %v110_v48 = vadd.f32 %v109_v46, %v108_v45 }
  0x58   :  { %193 = vlog2.f32 %v110_v48 }
  0x62   :  { %v194_v53 = vpop.eup %193 }
  0x63   :  { %v112_v54 = vmul.f32 0.6931472, %v194_v53 }
  0x65   :  { %v113_v55 = vsub.f32 0.0, %v112_v54 }
  0x67   :  { %v138_v56 = vsel %vm137_vm2, %v113_v55, 0.0 }
  0x68   :  { %146 = vadd.xlane.f32.xlu0 %v138_v56 }
  0xf5   :  { %v147_v57 = vpop.xlane.xlu0 %146 }
  0xf6   :  { %v148_v58 = vrot.slane %v147_v57, 4 }
  0xf8   :  { %v149_v59 = vadd.f32 %v148_v58, %v147_v57 }
  0xfa   :  { %v150_v60 = vrot.slane %v149_v59, 2 }
  0xfc   :  { %v151_v61 = vadd.f32 %v150_v60, %v149_v59 }
  0xfe   :  { %v152_v62 = vrot.slane %v151_v61, 1 }
 0x100   :  { %v153_v63 = vadd.f32 %v152_v62, %v151_v61 }
 0x102   :  { %174 = vpush %v153_v63 }
 0x133   :  { %s175_s7 = spop %174 }
 0x134   :  { %v155_v0 = vstv %s175_s7 }
 0x135   :  { %157 = vst.msk [vmem:[#allocation8] sm:$0x1] %vm156_vm3, %v155_v0 }
 0x136   :  { %250 = shalt.err (!%p247_p6)
}
 0x137   :  { %s251_s12 = scalar_lea.hbm %s325_s2, 16 }
 0x138   :  { %p252_p7 = scmp.ne.s32.totalorder %s325_s2, %s251_s12  ;;  %p255_p8 = scmp.lt.u32.totalorder %s251_s12, %s325_s2 }
 0x13a   :  { %p257_p9 = pnand %p255_p8, %p252_p7 }
 0x13c   :  { %260 = shalt.err (!%p257_p9)
}
 0x13d   :  { %167 = dma.vmem_to_hbm [thread:$0]  %s165_s6, 16, %s325_s2, [#allocation5]  }
 0x13e   :  { %265 = dma.done.wait [#allocation5], 16  }
 0x13f   :  { %266 = vsyncadd [#allocation5], 4294967280 }
 0x140   :  { %171 = vsyncpa [#allocation4], 1 }
 0x141   :  { %172 = vsyncpa [#allocation7], 1 }
 0x142   :  { %173 = vsyncpa [#allocation5], 1 }

</bundles_post_ra>
